<compile_context>
chip_gen: v7x
topology: tpu7x:2x2x1
jax: 0.10.0
libtpu: 0.0.40
codegen_flags: <defaults>
</compile_context>

<pallas_src>
import jax
import jax.numpy as jnp
from jax.experimental import pallas as pl
from jax.experimental.pallas import tpu as pltpu

_SELU_ALPHA = 1.6732632423543772848170429916717
_SELU_SCALE = 1.0507009873554804934193349852946


def _selu(x):
    # select-based SELU: exp branch can't poison the positive side with NaN/Inf
    return _SELU_SCALE * jnp.where(x > 0, x, _SELU_ALPHA * (jnp.exp(x) - 1.0))


def _round_up(v, m):
    return ((v + m - 1) // m) * m


# ---------------------------------------------------------------------------
# Kernel
# ---------------------------------------------------------------------------
def fcnet_kernel(x_ref, w0_ref, b0_ref, w1_ref, b1_ref, w2_ref, b2_ref, o_ref):
    # Layer 0: Linear (eval-mode BN folded into W/b) -> SELU -> Dropout(id, eval)
    x = x_ref[...].astype(jnp.bfloat16)  # in-kernel cast; x streamed as f32
    h = jnp.dot(x, w0_ref[...], preferred_element_type=jnp.float32)
    h = _selu(h + b0_ref[...])

    # Layer 1: Linear (BN folded) -> SELU -> Dropout(identity, eval)
    h = jnp.dot(h.astype(jnp.bfloat16), w1_ref[...],
                preferred_element_type=jnp.float32)
    h = _selu(h + b1_ref[...])

    # Layer 2 (last): Linear -> SELU, narrow out_dim output (no dead columns)
    h = jnp.dot(h.astype(jnp.bfloat16), w2_ref[...],
                preferred_element_type=jnp.float32)
    h = _selu(h + b2_ref[...])

    o_ref[...] = h.astype(o_ref.dtype)


# ---------------------------------------------------------------------------
# Wrapper
# ---------------------------------------------------------------------------
def fcnet_forward(x, folded, *, tile_n=8192, min_grid_steps=2):
    """x: (N, in_dim) f32.  folded: dict from fold_params()."""
    n, in_dim = x.shape
    w0, b0 = folded["w0"], folded["b0"]
    w1, b1 = folded["w1"], folded["b1"]
    w2, b2 = folded["w2"], folded["b2"]
    h0, h1, out_dim = w0.shape[1], w1.shape[1], w2.shape[1]

    # --- batch tiling -------------------------------------------------------
    n8 = _round_up(n, 8)
    tile_n = max(8, min(tile_n, n8))
    # For large batches ensure >= min_grid_steps steps so v7x's 2 TensorCores
    # both get work (dimension_semantics=("parallel",)).  Only split when each
    # step still gets a fat tile, so single-TC parts don't pay extra per-step
    # overhead on small batches.
    if min_grid_steps > 1 and n8 >= min_grid_steps * 512:
        per_step = _round_up((n8 + min_grid_steps - 1) // min_grid_steps, 8)
        tile_n = min(tile_n, per_step)
    n_pad = _round_up(n, tile_n)
    if n_pad != n:  # pad only when actually needed (no-op for aligned batches)
        x = jnp.pad(x, ((0, n_pad - n), (0, 0)))

    grid = (n_pad // tile_n,)

    tile_map = lambda i: (i, 0)    # batch-tiled arrays
    const_map = lambda i: (0, 0)   # weights/biases: resident across grid steps

    in_specs = [
        pl.BlockSpec((tile_n, in_dim), tile_map),   # x (f32, cast in kernel)
        pl.BlockSpec((in_dim, h0), const_map),      # w0 (BN folded, bf16)
        pl.BlockSpec((1, h0), const_map),           # b0 (BN folded, f32)
        pl.BlockSpec((h0, h1), const_map),          # w1 (BN folded, bf16)
        pl.BlockSpec((1, h1), const_map),           # b1 (BN folded, f32)
        pl.BlockSpec((h1, out_dim), const_map),     # w2 (unpadded, bf16)
        pl.BlockSpec((1, out_dim), const_map),      # b2 (f32)
    ]
    out_specs = pl.BlockSpec((tile_n, out_dim), tile_map)

    flops = 2 * n_pad * (in_dim * h0 + h0 * h1 + h1 * out_dim)
    transcendentals = n_pad * (h0 + h1 + out_dim)
    bytes_accessed = (n_pad * in_dim * 4                        # f32 x in
                      + n_pad * out_dim * 4                     # f32 narrow out
                      + (in_dim * h0 + h0 * h1 + h1 * out_dim) * 2  # bf16 weights
                      + (h0 + h1 + out_dim) * 4)                # f32 biases

    out = pl.pallas_call(
        fcnet_kernel,
        out_shape=jax.ShapeDtypeStruct((n_pad, out_dim), jnp.float32),
        grid=grid,
        in_specs=in_specs,
        out_specs=out_specs,
        compiler_params=pltpu.CompilerParams(
            dimension_semantics=("parallel",)),
        cost_estimate=pl.CostEstimate(
            flops=flops,
            transcendentals=transcendentals,
            bytes_accessed=bytes_accessed),
    )(x, w0, b0, w1, b1, w2, b2)

    return out[:n]


# ---------------------------------------------------------------------------
# Parameters (PyTorch-equivalent, deterministic synthetic init)
# ---------------------------------------------------------------------------
def init_params(key, in_dim=32, layer_dims=(128, 64, 4)):
    """Linear weights stored transposed as (in_features, out_features)."""
    dims = [in_dim] + list(layer_dims)
    keys = jax.random.split(key, 6 * len(layer_dims))
    p = {"in_dim": in_dim, "layer_dims": tuple(layer_dims)}
    ki = 0
    for i in range(len(layer_dims)):
        fan_in, fan_out = dims[i], dims[i + 1]
        bound = 1.0 / float(fan_in) ** 0.5
        p[f"w{i}"] = jax.random.uniform(keys[ki], (fan_in, fan_out),
                                        jnp.float32, -bound, bound); ki += 1
        p[f"b{i}"] = jax.random.uniform(keys[ki], (1, fan_out),
                                        jnp.float32, -bound, bound); ki += 1
        if i < len(layer_dims) - 1:
            # BatchNorm1d (eval): gamma, beta, running_mean, running_var
            p[f"gamma{i}"] = 1.0 + 0.1 * jax.random.normal(keys[ki], (1, fan_out), jnp.float32); ki += 1
            p[f"beta{i}"] = 0.1 * jax.random.normal(keys[ki], (1, fan_out), jnp.float32); ki += 1
            p[f"rmean{i}"] = 0.05 * jax.random.normal(keys[ki], (1, fan_out), jnp.float32); ki += 1
            p[f"rvar{i}"] = 1.0 + 0.1 * jax.random.uniform(keys[ki], (1, fan_out), jnp.float32); ki += 1
    return p


def fold_params(p, eps=1e-5):
    """Fold eval-mode BN into the preceding Linear and cast matmul weights to
    bf16 (biases stay f32).  No output padding — the kernel writes out_dim."""
    layer_dims = p["layer_dims"]
    n_layers = len(layer_dims)
    folded = {"out_dim": layer_dims[-1]}
    for i in range(n_layers):
        w = p[f"w{i}"]
        b = p[f"b{i}"]
        if i < n_layers - 1:
            scale = p[f"gamma{i}"] / jnp.sqrt(p[f"rvar{i}"] + eps)   # (1, F)
            shift = p[f"beta{i}"] - p[f"rmean{i}"] * scale
            w = w * scale
            b = b * scale + shift
        folded[f"w{i}"] = w.astype(jnp.bfloat16)
        folded[f"b{i}"] = b.astype(jnp.float32)
    return folded


# ---------------------------------------------------------------------------
# References
# ---------------------------------------------------------------------------
def fcnet_reference_f32(x, p, eps=1e-5):
    """Pure-f32 eval-mode reference on the unfolded PyTorch-style params."""
    h = x
    n_layers = len(p["layer_dims"])
    for i in range(n_layers):
        h = h @ p[f"w{i}"] + p[f"b{i}"]
        if i < n_layers - 1:
            scale = p[f"gamma{i}"] / jnp.sqrt(p[f"rvar{i}"] + eps)
            h = (h - p[f"rmean{i}"]) * scale + p[f"beta{i}"]
        h = _selu(h)
    return h


def fcnet_reference_bf16(x, folded):
    """Pure-JAX reference mimicking the kernel's bf16-operand / f32-accum math."""
    h = x.astype(jnp.bfloat16)
    h = _selu(jnp.dot(h, folded["w0"], preferred_element_type=jnp.float32) + folded["b0"])
    h = _selu(jnp.dot(h.astype(jnp.bfloat16), folded["w1"],
                      preferred_element_type=jnp.float32) + folded["b1"])
    h = _selu(jnp.dot(h.astype(jnp.bfloat16), folded["w2"],
                      preferred_element_type=jnp.float32) + folded["b2"])
    return h


# ---------------------------------------------------------------------------
if __name__ == "__main__":
    key = jax.random.PRNGKey(0)
    k_param, k_x, k_x2 = jax.random.split(key, 3)

    in_dim = 32
    layer_dims = (128, 64, 4)

    params = init_params(k_param, in_dim=in_dim, layer_dims=layer_dims)
    folded = fold_params(params)

    # --- test 1: small batch, single grid step ------------------------------
    batch = 8
    x = jax.random.normal(k_x, (batch, in_dim), jnp.float32)
    out = jax.block_until_ready(fcnet_forward(x, folded))
    assert out.shape == (batch, layer_dims[-1])
    ref_bf16 = fcnet_reference_bf16(x, folded)
    ref_f32 = fcnet_reference_f32(x, params)
    assert jnp.allclose(out, ref_bf16, atol=1e-3, rtol=1e-3)
    assert jnp.allclose(out, ref_f32, atol=5e-2, rtol=5e-2)

    # --- test 2: batch > tile_n and not a tile multiple (grid + pad + slice) -
    batch2 = 300
    x2 = jax.random.normal(k_x2, (batch2, in_dim), jnp.float32)
    out2 = jax.block_until_ready(fcnet_forward(x2, folded, tile_n=128))
    assert out2.shape == (batch2, layer_dims[-1])
    assert jnp.allclose(out2, fcnet_reference_bf16(x2, folded), atol=1e-3, rtol=1e-3)
    assert jnp.allclose(out2, fcnet_reference_f32(x2, params), atol=5e-2, rtol=5e-2)

    print("KERNEL_OK")
</pallas_src>

<mosaic_0001>
module attributes {stable_mosaic.version = 11 : i64} {
  func.func @fcnet_kernel(%arg0: i32, %arg1: memref<8x32xf32, #tpu.memory_space<vmem>>, %arg2: memref<32x128xbf16, #tpu.memory_space<vmem>>, %arg3: memref<1x128xf32, #tpu.memory_space<vmem>>, %arg4: memref<128x64xbf16, #tpu.memory_space<vmem>>, %arg5: memref<1x64xf32, #tpu.memory_space<vmem>>, %arg6: memref<64x4xbf16, #tpu.memory_space<vmem>>, %arg7: memref<1x4xf32, #tpu.memory_space<vmem>>, %arg8: memref<8x4xf32, #tpu.memory_space<vmem>>) attributes {dimension_semantics = [#tpu.dimension_semantics<parallel>], iteration_bounds = array<i64: 1>, scalar_prefetch = 0 : i64, scratch_operands = 0 : i64, tpu.core_type = #tpu.core_type<tc>, window_params = [{transform_indices = @transform_0, window_bounds = array<i64: 8, 32>}, {pipeline_mode = #tpu.pipeline_mode<synchronous>, transform_indices = @transform_1, window_bounds = array<i64: 32, 128>}, {pipeline_mode = #tpu.pipeline_mode<synchronous>, transform_indices = @transform_2, window_bounds = array<i64: 1, 128>}, {pipeline_mode = #tpu.pipeline_mode<synchronous>, transform_indices = @transform_3, window_bounds = array<i64: 128, 64>}, {pipeline_mode = #tpu.pipeline_mode<synchronous>, transform_indices = @transform_4, window_bounds = array<i64: 1, 64>}, {pipeline_mode = #tpu.pipeline_mode<synchronous>, transform_indices = @transform_5, window_bounds = array<i64: 64, 4>}, {pipeline_mode = #tpu.pipeline_mode<synchronous>, transform_indices = @transform_6, window_bounds = array<i64: 1, 4>}, {transform_indices = @transform_7, window_bounds = array<i64: 8, 4>}]} {
    %c0 = arith.constant 0 : index
    %c0_0 = arith.constant 0 : index
    %0 = vector.load %arg1[%c0, %c0_0] : memref<8x32xf32, #tpu.memory_space<vmem>>, vector<8x32xf32>
    %1 = arith.truncf %0 : vector<8x32xf32> to vector<8x32xbf16>
    %c0_1 = arith.constant 0 : index
    %c0_2 = arith.constant 0 : index
    %2 = vector.load %arg2[%c0_1, %c0_2] : memref<32x128xbf16, #tpu.memory_space<vmem>>, vector<32x128xbf16>
    %cst = arith.constant dense<0.000000e+00> : vector<8x128xf32>
    %3 = tpu.matmul %1, %2, %cst {dimension_numbers = #tpu.dot_dimension_numbers<[1], [0], [0], [1], [0, 0, 1, 1], [], []>} : vector<8x32xbf16>, vector<32x128xbf16>, vector<8x128xf32> -> vector<8x128xf32>
    %c0_3 = arith.constant 0 : index
    %c0_4 = arith.constant 0 : index
    %4 = vector.load %arg3[%c0_3, %c0_4] : memref<1x128xf32, #tpu.memory_space<vmem>>, vector<1x128xf32>
    %5 = vector.broadcast %4 : vector<1x128xf32> to vector<8x128xf32>
    %6 = arith.addf %3, %5 : vector<8x128xf32>
    %cst_5 = arith.constant 0.000000e+00 : f32
    %7 = vector.broadcast %cst_5 : f32 to vector<8x128xf32>
    %8 = arith.cmpf ogt, %6, %7 : vector<8x128xf32>
    %9 = math.exp %6 : vector<8x128xf32>
    %cst_6 = arith.constant 1.000000e+00 : f32
    %10 = vector.broadcast %cst_6 : f32 to vector<8x128xf32>
    %11 = arith.subf %9, %10 : vector<8x128xf32>
    %cst_7 = arith.constant 1.67326319 : f32
    %12 = vector.broadcast %cst_7 : f32 to vector<8x128xf32>
    %13 = arith.mulf %12, %11 : vector<8x128xf32>
    %14 = arith.select %8, %6, %13 : vector<8x128xi1>, vector<8x128xf32>
    %cst_8 = arith.constant 1.05070102 : f32
    %15 = vector.broadcast %cst_8 : f32 to vector<8x128xf32>
    %16 = arith.mulf %15, %14 : vector<8x128xf32>
    %17 = arith.truncf %16 : vector<8x128xf32> to vector<8x128xbf16>
    %c0_9 = arith.constant 0 : index
    %c0_10 = arith.constant 0 : index
    %18 = vector.load %arg4[%c0_9, %c0_10] : memref<128x64xbf16, #tpu.memory_space<vmem>>, vector<128x64xbf16>
    %cst_11 = arith.constant dense<0.000000e+00> : vector<8x64xf32>
    %19 = tpu.matmul %17, %18, %cst_11 {dimension_numbers = #tpu.dot_dimension_numbers<[1], [0], [0], [1], [0, 0, 1, 1], [], []>} : vector<8x128xbf16>, vector<128x64xbf16>, vector<8x64xf32> -> vector<8x64xf32>
    %c0_12 = arith.constant 0 : index
    %c0_13 = arith.constant 0 : index
    %20 = vector.load %arg5[%c0_12, %c0_13] : memref<1x64xf32, #tpu.memory_space<vmem>>, vector<1x64xf32>
    %21 = vector.broadcast %20 : vector<1x64xf32> to vector<8x64xf32>
    %22 = arith.addf %19, %21 : vector<8x64xf32>
    %cst_14 = arith.constant 0.000000e+00 : f32
    %23 = vector.broadcast %cst_14 : f32 to vector<8x64xf32>
    %24 = arith.cmpf ogt, %22, %23 : vector<8x64xf32>
    %25 = math.exp %22 : vector<8x64xf32>
    %cst_15 = arith.constant 1.000000e+00 : f32
    %26 = vector.broadcast %cst_15 : f32 to vector<8x64xf32>
    %27 = arith.subf %25, %26 : vector<8x64xf32>
    %cst_16 = arith.constant 1.67326319 : f32
    %28 = vector.broadcast %cst_16 : f32 to vector<8x64xf32>
    %29 = arith.mulf %28, %27 : vector<8x64xf32>
    %30 = arith.select %24, %22, %29 : vector<8x64xi1>, vector<8x64xf32>
    %cst_17 = arith.constant 1.05070102 : f32
    %31 = vector.broadcast %cst_17 : f32 to vector<8x64xf32>
    %32 = arith.mulf %31, %30 : vector<8x64xf32>
    %33 = arith.truncf %32 : vector<8x64xf32> to vector<8x64xbf16>
    %c0_18 = arith.constant 0 : index
    %c0_19 = arith.constant 0 : index
    %34 = vector.load %arg6[%c0_18, %c0_19] : memref<64x4xbf16, #tpu.memory_space<vmem>>, vector<64x4xbf16>
    %cst_20 = arith.constant dense<0.000000e+00> : vector<8x4xf32>
    %35 = tpu.matmul %33, %34, %cst_20 {dimension_numbers = #tpu.dot_dimension_numbers<[1], [0], [0], [1], [0, 0, 1, 1], [], []>} : vector<8x64xbf16>, vector<64x4xbf16>, vector<8x4xf32> -> vector<8x4xf32>
    %c0_21 = arith.constant 0 : index
    %c0_22 = arith.constant 0 : index
    %36 = vector.load %arg7[%c0_21, %c0_22] : memref<1x4xf32, #tpu.memory_space<vmem>>, vector<1x4xf32>
    %37 = vector.broadcast %36 : vector<1x4xf32> to vector<8x4xf32>
    %38 = arith.addf %35, %37 : vector<8x4xf32>
    %cst_23 = arith.constant 0.000000e+00 : f32
    %39 = vector.broadcast %cst_23 : f32 to vector<8x4xf32>
    %40 = arith.cmpf ogt, %38, %39 : vector<8x4xf32>
    %41 = math.exp %38 : vector<8x4xf32>
    %cst_24 = arith.constant 1.000000e+00 : f32
    %42 = vector.broadcast %cst_24 : f32 to vector<8x4xf32>
    %43 = arith.subf %41, %42 : vector<8x4xf32>
    %cst_25 = arith.constant 1.67326319 : f32
    %44 = vector.broadcast %cst_25 : f32 to vector<8x4xf32>
    %45 = arith.mulf %44, %43 : vector<8x4xf32>
    %46 = arith.select %40, %38, %45 : vector<8x4xi1>, vector<8x4xf32>
    %cst_26 = arith.constant 1.05070102 : f32
    %47 = vector.broadcast %cst_26 : f32 to vector<8x4xf32>
    %48 = arith.mulf %47, %46 : vector<8x4xf32>
    %c0_27 = arith.constant 0 : index
    %c0_28 = arith.constant 0 : index
    %49 = vector.load %arg8[%c0_27, %c0_28] : memref<8x4xf32, #tpu.memory_space<vmem>>, vector<8x4xf32>
    tpu.vector_store %arg8[%c0_27, %c0_28], %48 {strides = array<i32>} : memref<8x4xf32, #tpu.memory_space<vmem>>, vector<8x4xf32>,
    return
  }
  func.func @transform_0(%arg0: i32) -> (i32, i32) {
    %c0_i32 = arith.constant 0 : i32
    %c0_i32_0 = arith.constant 0 : i32
    return %arg0, %c0_i32 : i32, i32
  }
  func.func @transform_1(%arg0: i32) -> (i32, i32) {
    %c0_i32 = arith.constant 0 : i32
    %c0_i32_0 = arith.constant 0 : i32
    %c0_i32_1 = arith.constant 0 : i32
    return %c0_i32, %c0_i32_0 : i32, i32
  }
  func.func @transform_2(%arg0: i32) -> (i32, i32) {
    %c0_i32 = arith.constant 0 : i32
    %c0_i32_0 = arith.constant 0 : i32
    %c0_i32_1 = arith.constant 0 : i32
    return %c0_i32, %c0_i32_0 : i32, i32
  }
  func.func @transform_3(%arg0: i32) -> (i32, i32) {
    %c0_i32 = arith.constant 0 : i32
    %c0_i32_0 = arith.constant 0 : i32
    %c0_i32_1 = arith.constant 0 : i32
    return %c0_i32, %c0_i32_0 : i32, i32
  }
  func.func @transform_4(%arg0: i32) -> (i32, i32) {
    %c0_i32 = arith.constant 0 : i32
    %c0_i32_0 = arith.constant 0 : i32
    %c0_i32_1 = arith.constant 0 : i32
    return %c0_i32, %c0_i32_0 : i32, i32
  }
  func.func @transform_5(%arg0: i32) -> (i32, i32) {
    %c0_i32 = arith.constant 0 : i32
    %c0_i32_0 = arith.constant 0 : i32
    %c0_i32_1 = arith.constant 0 : i32
    return %c0_i32, %c0_i32_0 : i32, i32
  }
  func.func @transform_6(%arg0: i32) -> (i32, i32) {
    %c0_i32 = arith.constant 0 : i32
    %c0_i32_0 = arith.constant 0 : i32
    %c0_i32_1 = arith.constant 0 : i32
    return %c0_i32, %c0_i32_0 : i32, i32
  }
  func.func @transform_7(%arg0: i32) -> (i32, i32) {
    %c0_i32 = arith.constant 0 : i32
    %c0_i32_0 = arith.constant 0 : i32
    return %arg0, %c0_i32 : i32, i32
  }
}

</mosaic_0001>

<bundles_post_ra>
// kernel: tpu_custom_call.1
= control target key start
LH: loop header
LB: loop body
LE: loop exit
PB: predicated region body
PF: predicated region fallthrough
CT: control target
= control target key end

     0   :  { %v420_v0 = vmov 0.0   ;;  %vm421_vm0 = vmmov 0   ;;  %vm52_vm1 = vcmask 261120   ;;  %vm262_vm4 = vcmask 523264   ;;  %s539_s1 = inlined_call_operand.vmem [shape: bf16[32,128], index: 1, kind: input, shape index: {}]   ;;  %s540_s0 = inlined_call_operand.vmem [shape: f32[8,32], index: 0, kind: input, shape index: {}]   ;;  %s541_s3 = inlined_call_operand.vmem [shape: bf16[128,64], index: 3, kind: input, shape index: {}]   ;;  %s542_s2 = inlined_call_operand.vmem [shape: f32[1,128], index: 2, kind: input, shape index: {}]   ;;  %s543_s5 = inlined_call_operand.vmem [shape: bf16[64,4], index: 5, kind: input, shape index: {}]   ;;  %s544_s4 = inlined_call_operand.vmem [shape: f32[1,64], index: 4, kind: input, shape index: {}]   ;;  %s545_s6 = inlined_call_operand.vmem [shape: f32[1,4], index: 6, kind: input, shape index: {}]   ;;  %s546_s7 = inlined_call_operand.vmem [shape: f32[8,4], index: 7, kind: output, shape index: {}]  }
   0x1   :  { %358 = vmatprep.subr.bf16.mxu0 %v420_v0  ;;  %v400_v1 = vld [vmem:[%s539_s1] sm:$0xff]   ;;  %362 = vmatprep.mubr.msk.bf16.mxu0 %vm421_vm0, %v420_v0  ;;  %v401_v2 = vld [vmem:[%s539_s1 + $0x8] sm:$0xff]   ;;  %v404_v7 = vld [vmem:[%s541_s3 + $0x10] sm:$0xff]   ;;  %vm313_vm6 = vcmask 31744  }
   0x2   :  { %366 = vmatprep.subr.bf16.mxu1 %v420_v0  ;;  %382 = vmatprep.mubr.msk.bf16.mxu1 %vm421_vm0, %v420_v0  ;;  %v27_v3 = vld [vmem:[%s540_s0] sm:$0xff]  ;;  %v403_v5 = vld [vmem:[%s541_s3 + $0x8] sm:$0xff]   ;;  %v405_v8 = vld [vmem:[%s541_s3 + $0x18] sm:$0xff]  }
   0x3   :  { %359 = vmatpush3.bf16.msra.mxu0 %v400_v1  ;;  %v402_v4 = vld [vmem:[%s541_s3] sm:$0xff]   ;;  %v28_v6 = vpack.c.bf16 %v27_v3, %v27_v3  ;;  %v407_v10 = vld [vmem:[%s541_s3 + $0x28] sm:$0xff]   ;;  %v408_v11 = vld [vmem:[%s541_s3 + $0x30] sm:$0xff]  }
   0x4   :  { %360 = vmatprep.subr.bf16.mxu0 %v420_v0  ;;  %367 = vmatpush3.bf16.msra.mxu1 %v402_v4  ;;  %v406_v9 = vld [vmem:[%s541_s3 + $0x20] sm:$0xff]   ;;  %v409_v12 = vld [vmem:[%s541_s3 + $0x38] sm:$0xff]   ;;  %v411_v27 = vld [vmem:[%s543_s5 + $0x8] sm:$0xff]  }
   0x5   :  { %368 = vmatprep.subr.bf16.mxu1 %v420_v0  ;;  %v319_v13 = vld [vmem:[%s542_s2] ss:$0 sm:$0xff]  ;;  %v412_v28 = vld [vmem:[%s543_s5 + $0x10] sm:$0xff]   ;;  %v413_v29 = vld [vmem:[%s543_s5 + $0x18] sm:$0xff]  }
   0x6   :  { %v410_v26 = vld [vmem:[%s543_s5] sm:$0xff]  }
   0x7   :  { %361 = vmatpush3.bf16.msra.mxu0 %v401_v2  ;;  %v324_v30 = vld [vmem:[%s544_s4] ss:$0 sm:$0xff] }
   0x8   :  { %386 = vmatprep.subr.bf16.mxu0 %v420_v0  ;;  %369 = vmatpush3.bf16.msra.mxu1 %v403_v5  ;;  %v334_v43 = vld [vmem:[%s545_s6] ss:$0 sm:$0xff] }
   0x9   :  { %370 = vmatprep.subr.bf16.mxu1 %v420_v0 }
   0xa   :  { %363 = vmatmul.mubr.msk.bf16.vlgmr.msra.gmra.mrb[0].mxu0 %vm52_vm1, %v28_v6 }
   0xb   :  { %394 = vmatprep.mubr.msk.bf16.mxu0 %vm421_vm0, %v420_v0  ;;  %387 = vmatpush3.bf16.msra.mxu0 %v410_v26 }
   0xc   :  { %371 = vmatpush3.bf16.msra.mxu1 %v404_v7  ;;  %388 = vmatprep.subr.bf16.mxu0 %v420_v0 }
   0xd   :  { %372 = vmatprep.subr.bf16.mxu1 %v420_v0 }
   0xf   :  { %389 = vmatpush3.bf16.msra.mxu0 %v411_v27 }
  0x10   :  { %373 = vmatpush3.bf16.msra.mxu1 %v405_v8  ;;  %390 = vmatprep.subr.bf16.mxu0 %v420_v0 }
  0x11   :  { %374 = vmatprep.subr.bf16.mxu1 %v420_v0 }
  0x13   :  { %391 = vmatpush3.bf16.msra.mxu0 %v412_v28 }
  0x14   :  { %375 = vmatpush3.bf16.msra.mxu1 %v406_v9  ;;  %392 = vmatprep.subr.bf16.mxu0 %v420_v0 }
  0x15   :  { %376 = vmatprep.subr.bf16.mxu1 %v420_v0 }
  0x17   :  { %393 = vmatpush3.bf16.msra.mxu0 %v413_v29 }
  0x18   :  { %377 = vmatpush3.bf16.msra.mxu1 %v407_v10 }
  0x19   :  { %378 = vmatprep.subr.bf16.mxu1 %v420_v0 }
  0x1c   :  { %379 = vmatpush3.bf16.msra.mxu1 %v408_v11 }
  0x1d   :  { %380 = vmatprep.subr.bf16.mxu1 %v420_v0 }
  0x20   :  { %381 = vmatpush3.bf16.msra.mxu1 %v409_v12 }
  0xdd   :  { %v90_v14 = vpop.f32.mrb[0].mxu0 }
  0xde   :  { %v91_v15 = vadd.f32 %v319_v13, %v90_v14  ;;  %v364_v16 = vpop.f32.mrb[1].mxu0 }
  0xdf   :  { %v93_v17 = vpop.f32.mrb[2].mxu0 }
  0xe0   :  { %v97_v18 = vmul.f32 1.442695, %v91_v15  ;;  %v365_v19 = vpop.f32.mrb[3].mxu0  ;;  %vm96_vm2 = vcmp.gt.f32.partialorder %v91_v15, 0.0 }
  0xe2   :  { %414 = vpow2.f32 %v97_v18 }
  0xec   :  { %v415_v20 = vpop.eup %414 }
  0xed   :  { %v323_v21 = vadd.f32 -1.0, %v415_v20 }
  0xef   :  { %v100_v22 = vmul.f32 1.6732632, %v323_v21 }
  0xf1   :  { %v101_v23 = vsel %vm96_vm2, %v91_v15, %v100_v22 }
  0xf2   :  { %v102_v24 = vmul.f32 1.050701, %v101_v23 }
  0xf4   :  { %v103_v25 = vpack.c.bf16 %v102_v24, %v102_v24 }
  0xf6   :  { %383 = vmatmul.mubr.bf16.vlgmr.msra.gmra.mrb[0].mxu1 %v103_v25 }
 0x1c9   :  { %v209_v31 = vpop.f32.mrb[0].mxu1 }
 0x1ca   :  { %v210_v32 = vadd.f32 %v324_v30, %v209_v31  ;;  %v384_v33 = vpop.f32.mrb[1].mxu1 }
 0x1cb   :  { %v212_v34 = vpop.f32.mrb[2].mxu1 }
 0x1cc   :  { %v216_v35 = vmul.f32 1.442695, %v210_v32  ;;  %v385_v36 = vpop.f32.mrb[3].mxu1  ;;  %vm215_vm3 = vcmp.gt.f32.partialorder %v210_v32, 0.0 }
 0x1ce   :  { %416 = vpow2.f32 %v216_v35 }
 0x1d8   :  { %v417_v37 = vpop.eup %416 }
 0x1d9   :  { %v333_v38 = vadd.f32 -1.0, %v417_v37 }
 0x1db   :  { %v219_v39 = vmul.f32 1.6732632, %v333_v38 }
 0x1dd   :  { %v220_v40 = vsel %vm215_vm3, %v210_v32, %v219_v39 }
 0x1de   :  { %v221_v41 = vmul.f32 1.050701, %v220_v40 }
 0x1e0   :  { %v222_v42 = vpack.c.bf16 %v221_v41, %v221_v41 }
 0x1e2   :  { %395 = vmatmul.mubr.msk.bf16.vlgmr.msra.gmra.mrb[4].mxu0 %vm262_vm4, %v222_v42 }
 0x2b5   :  { %v300_v44 = vpop.f32.mrb[4].mxu0 }
 0x2b6   :  { %v301_v45 = vadd.f32 %v334_v43, %v300_v44  ;;  %v396_v46 = vpop.f32.mrb[5].mxu0 }
 0x2b7   :  { %v303_v47 = vpop.f32.mrb[6].mxu0 }
 0x2b8   :  { %v307_v48 = vmul.f32 1.442695, %v301_v45  ;;  %v397_v49 = vpop.f32.mrb[7].mxu0  ;;  %vm306_vm5 = vcmp.gt.f32.partialorder %v301_v45, 0.0 }
 0x2ba   :  { %418 = vpow2.f32 %v307_v48 }
 0x2c4   :  { %v419_v50 = vpop.eup %418 }
 0x2c5   :  { %v340_v51 = vadd.f32 -1.0, %v419_v50 }
 0x2c7   :  { %v310_v52 = vmul.f32 1.6732632, %v340_v51 }
 0x2c9   :  { %v311_v53 = vsel %vm306_vm5, %v301_v45, %v310_v52 }
 0x2ca   :  { %v312_v54 = vmul.f32 1.050701, %v311_v53 }
 0x2cc   :  { %314 = vst.msk [vmem:[%s546_s7] sm:$0xff] %vm313_vm6, %v312_v54 }

</bundles_post_ra>
